<compile_context>
chip_gen: v7x
topology: tpu7x:2x2x1
jax: 0.10.0
libtpu: 0.0.40
codegen_flags: <defaults>
</compile_context>

<pallas_src>
import functools

import jax
import jax.numpy as jnp
from jax.experimental import pallas as pl
from jax.experimental.pallas import tpu as pltpu

LEAK = 0.2
BN_EPS = 1e-5


def _leaky(x):
    return jnp.where(x >= 0, x, LEAK * x)


def _round_up(x, m):
    return (x + m - 1) // m * m


def _pick_chunk(tn):
    # largest lane sub-chunk <= 512 that divides the tile (tn is a multiple of 128)
    for ch in (512, 384, 256, 128):
        if tn % ch == 0:
            return ch
    return tn


# ----------------------------------------------------------------------------
# Pallas kernel.  Per grid step it sees:
#   base_ref : (3+C, tn)      bf16   [xyz ; x]                (center points)
#   nbrs_ref : (K, 3+C, tn)   bf16   [nbr_xyz ; nbr_feat]     (per neighbour)
#   weights  : w0n (C, 3+C), w0b (C, 3+C), w1 (Co, C), w2 (Co, Co)   bf16
#   biases   : b0 (C,1), b1 (Co,1), b2 (Co,1)                        f32
# and computes, per <=512-lane sub-chunk:
#   base_term = w0b @ base + b0                    (neighbour-independent)
#   for each k:  h = leaky(w0n @ nbr_k + base_term)
#                h = leaky(w1 @ h + b1)
#                h = leaky(w2 @ h + b2)
#   out = mean_k h
# ----------------------------------------------------------------------------
def lpfa_kernel(base_ref, nbrs_ref, w0n_ref, w0b_ref, b0_ref,
                w1_ref, b1_ref, w2_ref, b2_ref, out_ref):
    k = nbrs_ref.shape[0]
    cout, tn = out_ref.shape
    ch = _pick_chunk(tn)
    n_chunks = tn // ch
    inv_k = 1.0 / k

    # Hoist parameter loads and bias lane-broadcasts out of all loops
    # (JAX does not CSE broadcast_in_dim inside unrolled loops).
    w0n = w0n_ref[...]                                  # (C, 3+C)   bf16
    w0b = w0b_ref[...]                                  # (C, 3+C)   bf16
    w1 = w1_ref[...]                                    # (Co, C)    bf16
    w2 = w2_ref[...]                                    # (Co, Co)   bf16
    b0 = b0_ref[...].astype(jnp.float32)                # (C, 1)
    b1 = jnp.broadcast_to(b1_ref[...].astype(jnp.float32), (cout, ch))
    b2 = jnp.broadcast_to(b2_ref[...].astype(jnp.float32), (cout, ch))

    def chunk(off):
        base = base_ref[:, pl.ds(off, ch)]              # (3+C, ch)  bf16
        # Neighbour-independent part of layer 0 (conv on center xyz, minus the
        # center feature for fdiff, plus folded BN bias) -- computed once.
        base_term = jnp.dot(w0b, base,
                            preferred_element_type=jnp.float32) + b0
        acc = jnp.zeros((cout, ch), jnp.float32)
        # K is small for CurveNet-sized configs; static unroll keeps each
        # neighbour load a contiguous (3+C, ch) slab.
        # TODO(synk): switch to lax.fori_loop(..., unroll=2) if K grows large
        # enough (>~32) to push live ranges past 64 vregs.
        for kk in range(k):
            slab = nbrs_ref[kk, :, pl.ds(off, ch)]      # (3+C, ch)  bf16
            h = _leaky(jnp.dot(w0n, slab,
                               preferred_element_type=jnp.float32) + base_term)
            h = _leaky(jnp.dot(w1, h.astype(jnp.bfloat16),
                               preferred_element_type=jnp.float32) + b1)
            h = _leaky(jnp.dot(w2, h.astype(jnp.bfloat16),
                               preferred_element_type=jnp.float32) + b2)
            acc = acc + h
        out_ref[:, pl.ds(off, ch)] = acc * inv_k

    if n_chunks == 1:
        chunk(0)
    else:
        @pl.loop(0, n_chunks)
        def _(ci):
            chunk(pl.multiple_of(ci * ch, ch))


def lpfa_pallas(base, nbrs, params, *, tn):
    """base: (B, 3+C, N_pad) bf16, nbrs: (B, K, 3+C, N_pad) bf16 -> (B, Co, N_pad) f32."""
    b, k, wdim, n_pad = nbrs.shape
    cout = params["w2"].shape[0]
    assert n_pad % tn == 0 and tn % 128 == 0
    grid = (b, n_pad // tn)

    def rep(arr):  # tiny parameter tensors: replicate whole array every tile
        return pl.BlockSpec(arr.shape, lambda bi, ji: (0,) * arr.ndim)

    # Size the scoped-VMEM request from the actual double-buffered tile
    # footprint (+ headroom), clamped to v7x's 64 MiB physical VMEM.
    tile_bytes = 2 * (k * wdim * tn * 2 + wdim * tn * 2 + cout * tn * 4)
    vmem_limit = int(min(max(tile_bytes + (4 << 20), 8 << 20), 64 << 20))

    return pl.pallas_call(
        lpfa_kernel,
        # TODO(synk): emit bf16 output if the downstream consumer tolerates it
        # (cuts ~15-20% of total HBM traffic at these widths).
        out_shape=jax.ShapeDtypeStruct((b, cout, n_pad), jnp.float32),
        grid_spec=pltpu.PrefetchScalarGridSpec(
            num_scalar_prefetch=0,
            grid=grid,
            in_specs=[
                # batch dim squeezed; kernel sees (3+C, tn) and (K, 3+C, tn)
                pl.BlockSpec((None, wdim, tn), lambda bi, ji: (bi, 0, ji)),
                pl.BlockSpec((None, k, wdim, tn), lambda bi, ji: (bi, 0, 0, ji)),
                rep(params["w0n"]), rep(params["w0b"]), rep(params["b0"]),
                rep(params["w1"]), rep(params["b1"]),
                rep(params["w2"]), rep(params["b2"]),
            ],
            # lane-dense output: (C_out, tn) with tn a multiple of 128
            out_specs=pl.BlockSpec((None, cout, tn), lambda bi, ji: (bi, 0, ji)),
        ),
        compiler_params=pltpu.CompilerParams(
            dimension_semantics=("parallel", "parallel"),
            vmem_limit_bytes=vmem_limit),
    )(base, nbrs, params["w0n"], params["w0b"], params["b0"],
      params["w1"], params["b1"], params["w2"], params["b2"])


# ----------------------------------------------------------------------------
# Glue (plain JAX): knn + neighbour gather, channel-major.
# ----------------------------------------------------------------------------
def knn_jax(xyz, k):
    # xyz: (B, 3, N); mirrors the PyTorch `knn` helper (topk of -||xi-xj||^2,
    # k+1 neighbours, the caller keeps the first k -- self included).
    inner = -2.0 * jnp.einsum("bcn,bcm->bnm", xyz, xyz)
    xx = jnp.sum(xyz ** 2, axis=1, keepdims=True)              # (B, 1, N)
    pairwise = -xx - inner - jnp.swapaxes(xx, 1, 2)            # (B, N, N)
    idx = jax.lax.top_k(pairwise, k + 1)[1]
    return idx[:, :, :k]                                       # (B, N, k)


def build_inputs(x, xyz, k):
    """x: (B, C, N), xyz: (B, 3, N) -> base (B, 3+C, N), nbrs (B, K, 3+C, N)."""
    # TODO(synk): the knn gather could be fused into the kernel (scalar-prefetch
    # idx + manual DMA gather from a VMEM-resident base) to avoid the K-fold
    # duplicated neighbour tensor in HBM; here it stays in XLA glue.
    idx = knn_jax(xyz, k)                                      # (B, N, k)
    idx_t = jnp.swapaxes(idx, 1, 2)                            # (B, k, N)
    base = jnp.concatenate([xyz, x], axis=1)                   # (B, 3+C, N)
    gather = jax.vmap(lambda a, i: a[:, i])                    # (W,N),(k,N)->(W,k,N)
    nbrs = jnp.swapaxes(gather(base, idx_t), 1, 2)             # (B, k, 3+C, N)
    return base, nbrs


def lpfa_forward(x, xyz, folded, k, *, tn_target=2048):
    b, c_in, n = x.shape
    base, nbrs = build_inputs(x, xyz, k)
    base = base.astype(jnp.bfloat16)                           # bf16 HBM->VMEM path
    nbrs = nbrs.astype(jnp.bfloat16)

    # Large lane-dense tiles to amortize per-grid-step overhead.
    if n >= tn_target:
        tn = tn_target
        n_pad = _round_up(n, tn)
    else:
        n_pad = _round_up(n, 128)
        tn = n_pad
    # Keep >= 2 grid steps along a parallel axis for dual-TC (v7x) parts.
    if b == 1 and n_pad // tn < 2 and _round_up(n, 256) >= 256 and n > 128:
        n_pad = _round_up(n, 256)
        tn = n_pad // 2

    if n_pad != n:
        base = jnp.pad(base, ((0, 0), (0, 0), (0, n_pad - n)))
        nbrs = jnp.pad(nbrs, ((0, 0), (0, 0), (0, 0), (0, n_pad - n)))

    out = lpfa_pallas(base, nbrs, folded, tn=tn)               # (B, C_out, n_pad)
    return out[:, :, :n]                                       # (B, C_out, N)


# ----------------------------------------------------------------------------
# Deterministic parameter init (conv weights + eval-mode BatchNorm) + folding.
# ----------------------------------------------------------------------------
def init_params(key, c_in, c_out):
    keys = jax.random.split(key, 15)

    def bn_fold(k0, k1, k2, k3, c):
        gamma = 1.0 + 0.1 * jax.random.normal(k0, (c,), jnp.float32)
        beta = 0.1 * jax.random.normal(k1, (c,), jnp.float32)
        mean = 0.1 * jax.random.normal(k2, (c,), jnp.float32)
        var = jnp.abs(jax.random.normal(k3, (c,), jnp.float32)) + 0.5
        scale = gamma / jnp.sqrt(var + BN_EPS)
        bias = beta - mean * scale
        return scale.reshape(1, c), bias.reshape(1, c)

    # Conv2d weights (kernel_size=1, bias=False), stored as (C_in_of_conv, C_out).
    w0 = 0.2 * jax.random.normal(keys[0], (9, c_in), jnp.float32)
    w1 = 0.2 * jax.random.normal(keys[1], (c_in, c_out), jnp.float32)
    w2 = 0.2 * jax.random.normal(keys[2], (c_out, c_out), jnp.float32)
    s0, b0 = bn_fold(keys[3], keys[4], keys[5], keys[6], c_in)
    s1, b1 = bn_fold(keys[7], keys[8], keys[9], keys[10], c_out)
    s2, b2 = bn_fold(keys[11], keys[12], keys[13], keys[14], c_out)
    return dict(w0=w0, s0=s0, b0=b0, w1=w1, s1=s1, b1=b1, w2=w2, s2=s2, b2=b2)


def fold_params(raw):
    """Fold eval-mode BN scales into the (channel-major) conv weights and fold
    the geometric feature construction + residual centering into two matrices:
      w0 @ [p, q, q-p] + (q_ft - x_ft)  ==  w0n @ [q; q_ft] + w0b @ [p; x_ft]
    with w0n = [(Wb+Wc)*s0 | I],  w0b = [(Wa-Wc)*s0 | -I]."""
    c_in = raw["w0"].shape[1]
    w0t = (raw["w0"] * raw["s0"]).T                    # (C_in, 9), BN folded
    wp = w0t[:, 0:3] - w0t[:, 6:9]                     # acts on center xyz
    wq = w0t[:, 3:6] + w0t[:, 6:9]                     # acts on neighbour xyz
    eye = jnp.eye(c_in, dtype=jnp.float32)
    w0n = jnp.concatenate([wq, eye], axis=1)           # @ [nbr_xyz ; nbr_feat]
    w0b = jnp.concatenate([wp, -eye], axis=1)          # @ [xyz ; x]
    return dict(
        w0n=w0n.astype(jnp.bfloat16),
        w0b=w0b.astype(jnp.bfloat16),
        b0=raw["b0"].reshape(c_in, 1).astype(jnp.float32),
        w1=(raw["w1"] * raw["s1"]).T.astype(jnp.bfloat16),
        b1=raw["b1"].reshape(-1, 1).astype(jnp.float32),
        w2=(raw["w2"] * raw["s2"]).T.astype(jnp.bfloat16),
        b2=raw["b2"].reshape(-1, 1).astype(jnp.float32),
    )


# Pure-JAX reference (mirrors the PyTorch module's eval-mode math, f32, unfolded).
def lpfa_ref(x, xyz, p, k):
    xyz_t = jnp.swapaxes(xyz, 1, 2)                            # (B, N, 3)
    x_t = jnp.swapaxes(x, 1, 2)                                # (B, N, C)
    idx = knn_jax(xyz, k)                                      # (B, N, k)
    gather = jax.vmap(lambda pts, i: pts[i])
    pf_xyz = gather(xyz_t, idx)                                # (B, N, k, 3)
    feat = gather(x_t, idx)                                    # (B, N, k, C)
    points = jnp.broadcast_to(xyz_t[:, :, None, :], pf_xyz.shape)
    pf9 = jnp.concatenate([points, pf_xyz, pf_xyz - points], axis=-1)
    pf = jnp.einsum("bnkf,fc->bnkc", pf9, p["w0"]) * p["s0"] + p["b0"]
    h = _leaky((feat - x_t[:, :, None, :]) + pf)
    h = _leaky(jnp.einsum("bnkc,cd->bnkd", h, p["w1"]) * p["s1"] + p["b1"])
    h = _leaky(jnp.einsum("bnkd,de->bnke", h, p["w2"]) * p["s2"] + p["b2"])
    out = jnp.mean(h, axis=2)                                  # (B, N, C_out)
    return jnp.transpose(out, (0, 2, 1))                       # (B, C_out, N)


if __name__ == "__main__":
    B, C_IN, C_OUT, N, K = 2, 8, 16, 16, 4

    key = jax.random.PRNGKey(0)
    kx, kxyz, kp = jax.random.split(key, 3)
    x = jax.random.normal(kx, (B, C_IN, N), jnp.float32)       # features (B, C, N)
    xyz = jax.random.normal(kxyz, (B, 3, N), jnp.float32)      # coords   (B, 3, N)
    raw = init_params(kp, C_IN, C_OUT)
    folded = fold_params(raw)

    fwd = jax.jit(functools.partial(lpfa_forward, k=K))
    out = jax.block_until_ready(fwd(x, xyz, folded))
    assert out.shape == (B, C_OUT, N), out.shape

    # sanity-check the Pallas path against the pure-JAX (f32, unfolded) reference
    ref = lpfa_ref(x, xyz, raw, K)
    max_err = float(jnp.max(jnp.abs(out - ref)))
    assert jnp.allclose(out, ref, rtol=2e-2, atol=2e-2), f"mismatch {max_err}"

    print("KERNEL_OK")
</pallas_src>

<mosaic_0001>
module attributes {stable_mosaic.version = 11 : i64} {
  func.func @lpfa_kernel(%arg0: i32, %arg1: i32, %arg2: memref<1x11x128xbf16, #tpu.memory_space<vmem>>, %arg3: memref<1x4x11x128xbf16, #tpu.memory_space<vmem>>, %arg4: memref<8x11xbf16, #tpu.memory_space<vmem>>, %arg5: memref<8x11xbf16, #tpu.memory_space<vmem>>, %arg6: memref<8x1xf32, #tpu.memory_space<vmem>>, %arg7: memref<16x8xbf16, #tpu.memory_space<vmem>>, %arg8: memref<16x1xf32, #tpu.memory_space<vmem>>, %arg9: memref<16x16xbf16, #tpu.memory_space<vmem>>, %arg10: memref<16x1xf32, #tpu.memory_space<vmem>>, %arg11: memref<1x16x128xf32, #tpu.memory_space<vmem>>) attributes {dimension_semantics = [#tpu.dimension_semantics<parallel>, #tpu.dimension_semantics<parallel>], iteration_bounds = array<i64: 2, 1>, scalar_prefetch = 0 : i64, scratch_operands = 0 : i64, tpu.core_type = #tpu.core_type<tc>, window_params = [{transform_indices = @transform_0, window_bounds = array<i64: 1, 11, 128>}, {transform_indices = @transform_1, window_bounds = array<i64: 1, 4, 11, 128>}, {pipeline_mode = #tpu.pipeline_mode<synchronous>, transform_indices = @transform_2, window_bounds = array<i64: 8, 11>}, {pipeline_mode = #tpu.pipeline_mode<synchronous>, transform_indices = @transform_3, window_bounds = array<i64: 8, 11>}, {pipeline_mode = #tpu.pipeline_mode<synchronous>, transform_indices = @transform_4, window_bounds = array<i64: 8, 1>}, {pipeline_mode = #tpu.pipeline_mode<synchronous>, transform_indices = @transform_5, window_bounds = array<i64: 16, 8>}, {pipeline_mode = #tpu.pipeline_mode<synchronous>, transform_indices = @transform_6, window_bounds = array<i64: 16, 1>}, {pipeline_mode = #tpu.pipeline_mode<synchronous>, transform_indices = @transform_7, window_bounds = array<i64: 16, 16>}, {pipeline_mode = #tpu.pipeline_mode<synchronous>, transform_indices = @transform_8, window_bounds = array<i64: 16, 1>}, {transform_indices = @transform_9, window_bounds = array<i64: 1, 16, 128>}]} {
    %c0 = arith.constant 0 : index
    %c0_0 = arith.constant 0 : index
    %0 = vector.load %arg4[%c0, %c0_0] : memref<8x11xbf16, #tpu.memory_space<vmem>>, vector<8x11xbf16>
    %c0_1 = arith.constant 0 : index
    %c0_2 = arith.constant 0 : index
    %1 = vector.load %arg5[%c0_1, %c0_2] : memref<8x11xbf16, #tpu.memory_space<vmem>>, vector<8x11xbf16>
    %c0_3 = arith.constant 0 : index
    %c0_4 = arith.constant 0 : index
    %2 = vector.load %arg7[%c0_3, %c0_4] : memref<16x8xbf16, #tpu.memory_space<vmem>>, vector<16x8xbf16>
    %c0_5 = arith.constant 0 : index
    %c0_6 = arith.constant 0 : index
    %3 = vector.load %arg9[%c0_5, %c0_6] : memref<16x16xbf16, #tpu.memory_space<vmem>>, vector<16x16xbf16>
    %c0_7 = arith.constant 0 : index
    %c0_8 = arith.constant 0 : index
    %4 = vector.load %arg6[%c0_7, %c0_8] : memref<8x1xf32, #tpu.memory_space<vmem>>, vector<8x1xf32>
    %c0_9 = arith.constant 0 : index
    %c0_10 = arith.constant 0 : index
    %5 = vector.load %arg8[%c0_9, %c0_10] : memref<16x1xf32, #tpu.memory_space<vmem>>, vector<16x1xf32>
    %6 = vector.shape_cast %5 : vector<16x1xf32> to vector<16x1xf32>
    %7 = vector.broadcast %6 : vector<16x1xf32> to vector<16x128xf32>
    %c0_11 = arith.constant 0 : index
    %c0_12 = arith.constant 0 : index
    %8 = vector.load %arg10[%c0_11, %c0_12] : memref<16x1xf32, #tpu.memory_space<vmem>>, vector<16x1xf32>
    %9 = vector.shape_cast %8 : vector<16x1xf32> to vector<16x1xf32>
    %10 = vector.broadcast %9 : vector<16x1xf32> to vector<16x128xf32>
    %c0_13 = arith.constant 0 : index
    %c0_14 = arith.constant 0 : index
    %c0_15 = arith.constant 0 : index
    %11 = vector.load %arg2[%c0_13, %c0_14, %c0_15] : memref<1x11x128xbf16, #tpu.memory_space<vmem>>, vector<1x11x128xbf16>
    %12 = vector.shape_cast %11 : vector<1x11x128xbf16> to vector<11x128xbf16>
    %cst = arith.constant dense<0.000000e+00> : vector<8x128xf32>
    %13 = tpu.matmul %1, %12, %cst {dimension_numbers = #tpu.dot_dimension_numbers<[1], [0], [0], [1], [0, 0, 1, 1], [], []>} : vector<8x11xbf16>, vector<11x128xbf16>, vector<8x128xf32> -> vector<8x128xf32>
    %14 = vector.broadcast %4 : vector<8x1xf32> to vector<8x128xf32>
    %15 = arith.addf %13, %14 : vector<8x128xf32>
    %cst_16 = arith.constant 0.000000e+00 : f32
    %16 = vector.broadcast %cst_16 : f32 to vector<16x128xf32>
    %c0_17 = arith.constant 0 : index
    %c0_18 = arith.constant 0 : index
    %c0_19 = arith.constant 0 : index
    %c0_20 = arith.constant 0 : index
    %17 = vector.load %arg3[%c0_17, %c0_18, %c0_19, %c0_20] : memref<1x4x11x128xbf16, #tpu.memory_space<vmem>>, vector<1x1x11x128xbf16>
    %18 = vector.shape_cast %17 : vector<1x1x11x128xbf16> to vector<11x128xbf16>
    %cst_21 = arith.constant dense<0.000000e+00> : vector<8x128xf32>
    %19 = tpu.matmul %0, %18, %cst_21 {dimension_numbers = #tpu.dot_dimension_numbers<[1], [0], [0], [1], [0, 0, 1, 1], [], []>} : vector<8x11xbf16>, vector<11x128xbf16>, vector<8x128xf32> -> vector<8x128xf32>
    %20 = arith.addf %19, %15 : vector<8x128xf32>
    %cst_22 = arith.constant 0.000000e+00 : f32
    %21 = vector.broadcast %cst_22 : f32 to vector<8x128xf32>
    %22 = arith.cmpf oge, %20, %21 : vector<8x128xf32>
    %cst_23 = arith.constant 2.000000e-01 : f32
    %23 = vector.broadcast %cst_23 : f32 to vector<8x128xf32>
    %24 = arith.mulf %23, %20 : vector<8x128xf32>
    %25 = arith.select %22, %20, %24 : vector<8x128xi1>, vector<8x128xf32>
    %26 = arith.truncf %25 : vector<8x128xf32> to vector<8x128xbf16>
    %cst_24 = arith.constant dense<0.000000e+00> : vector<16x128xf32>
    %27 = tpu.matmul %2, %26, %cst_24 {dimension_numbers = #tpu.dot_dimension_numbers<[1], [0], [0], [1], [0, 0, 1, 1], [], []>} : vector<16x8xbf16>, vector<8x128xbf16>, vector<16x128xf32> -> vector<16x128xf32>
    %28 = arith.addf %27, %7 : vector<16x128xf32>
    %cst_25 = arith.constant 0.000000e+00 : f32
    %29 = vector.broadcast %cst_25 : f32 to vector<16x128xf32>
    %30 = arith.cmpf oge, %28, %29 : vector<16x128xf32>
    %cst_26 = arith.constant 2.000000e-01 : f32
    %31 = vector.broadcast %cst_26 : f32 to vector<16x128xf32>
    %32 = arith.mulf %31, %28 : vector<16x128xf32>
    %33 = arith.select %30, %28, %32 : vector<16x128xi1>, vector<16x128xf32>
    %34 = arith.truncf %33 : vector<16x128xf32> to vector<16x128xbf16>
    %cst_27 = arith.constant dense<0.000000e+00> : vector<16x128xf32>
    %35 = tpu.matmul %3, %34, %cst_27 {dimension_numbers = #tpu.dot_dimension_numbers<[1], [0], [0], [1], [0, 0, 1, 1], [], []>} : vector<16x16xbf16>, vector<16x128xbf16>, vector<16x128xf32> -> vector<16x128xf32>
    %36 = arith.addf %35, %10 : vector<16x128xf32>
    %cst_28 = arith.constant 0.000000e+00 : f32
    %37 = vector.broadcast %cst_28 : f32 to vector<16x128xf32>
    %38 = arith.cmpf oge, %36, %37 : vector<16x128xf32>
    %cst_29 = arith.constant 2.000000e-01 : f32
    %39 = vector.broadcast %cst_29 : f32 to vector<16x128xf32>
    %40 = arith.mulf %39, %36 : vector<16x128xf32>
    %41 = arith.select %38, %36, %40 : vector<16x128xi1>, vector<16x128xf32>
    %42 = arith.addf %16, %41 : vector<16x128xf32>
    %c0_30 = arith.constant 0 : index
    %c1 = arith.constant 1 : index
    %c0_31 = arith.constant 0 : index
    %c0_32 = arith.constant 0 : index
    %43 = vector.load %arg3[%c0_30, %c1, %c0_31, %c0_32] : memref<1x4x11x128xbf16, #tpu.memory_space<vmem>>, vector<1x1x11x128xbf16>
    %44 = vector.shape_cast %43 : vector<1x1x11x128xbf16> to vector<11x128xbf16>
    %cst_33 = arith.constant dense<0.000000e+00> : vector<8x128xf32>
    %45 = tpu.matmul %0, %44, %cst_33 {dimension_numbers = #tpu.dot_dimension_numbers<[1], [0], [0], [1], [0, 0, 1, 1], [], []>} : vector<8x11xbf16>, vector<11x128xbf16>, vector<8x128xf32> -> vector<8x128xf32>
    %46 = arith.addf %45, %15 : vector<8x128xf32>
    %cst_34 = arith.constant 0.000000e+00 : f32
    %47 = vector.broadcast %cst_34 : f32 to vector<8x128xf32>
    %48 = arith.cmpf oge, %46, %47 : vector<8x128xf32>
    %cst_35 = arith.constant 2.000000e-01 : f32
    %49 = vector.broadcast %cst_35 : f32 to vector<8x128xf32>
    %50 = arith.mulf %49, %46 : vector<8x128xf32>
    %51 = arith.select %48, %46, %50 : vector<8x128xi1>, vector<8x128xf32>
    %52 = arith.truncf %51 : vector<8x128xf32> to vector<8x128xbf16>
    %cst_36 = arith.constant dense<0.000000e+00> : vector<16x128xf32>
    %53 = tpu.matmul %2, %52, %cst_36 {dimension_numbers = #tpu.dot_dimension_numbers<[1], [0], [0], [1], [0, 0, 1, 1], [], []>} : vector<16x8xbf16>, vector<8x128xbf16>, vector<16x128xf32> -> vector<16x128xf32>
    %54 = arith.addf %53, %7 : vector<16x128xf32>
    %cst_37 = arith.constant 0.000000e+00 : f32
    %55 = vector.broadcast %cst_37 : f32 to vector<16x128xf32>
    %56 = arith.cmpf oge, %54, %55 : vector<16x128xf32>
    %cst_38 = arith.constant 2.000000e-01 : f32
    %57 = vector.broadcast %cst_38 : f32 to vector<16x128xf32>
    %58 = arith.mulf %57, %54 : vector<16x128xf32>
    %59 = arith.select %56, %54, %58 : vector<16x128xi1>, vector<16x128xf32>
    %60 = arith.truncf %59 : vector<16x128xf32> to vector<16x128xbf16>
    %cst_39 = arith.constant dense<0.000000e+00> : vector<16x128xf32>
    %61 = tpu.matmul %3, %60, %cst_39 {dimension_numbers = #tpu.dot_dimension_numbers<[1], [0], [0], [1], [0, 0, 1, 1], [], []>} : vector<16x16xbf16>, vector<16x128xbf16>, vector<16x128xf32> -> vector<16x128xf32>
    %62 = arith.addf %61, %10 : vector<16x128xf32>
    %cst_40 = arith.constant 0.000000e+00 : f32
    %63 = vector.broadcast %cst_40 : f32 to vector<16x128xf32>
    %64 = arith.cmpf oge, %62, %63 : vector<16x128xf32>
    %cst_41 = arith.constant 2.000000e-01 : f32
    %65 = vector.broadcast %cst_41 : f32 to vector<16x128xf32>
    %66 = arith.mulf %65, %62 : vector<16x128xf32>
    %67 = arith.select %64, %62, %66 : vector<16x128xi1>, vector<16x128xf32>
    %68 = arith.addf %42, %67 : vector<16x128xf32>
    %c0_42 = arith.constant 0 : index
    %c2 = arith.constant 2 : index
    %c0_43 = arith.constant 0 : index
    %c0_44 = arith.constant 0 : index
    %69 = vector.load %arg3[%c0_42, %c2, %c0_43, %c0_44] : memref<1x4x11x128xbf16, #tpu.memory_space<vmem>>, vector<1x1x11x128xbf16>
    %70 = vector.shape_cast %69 : vector<1x1x11x128xbf16> to vector<11x128xbf16>
    %cst_45 = arith.constant dense<0.000000e+00> : vector<8x128xf32>
    %71 = tpu.matmul %0, %70, %cst_45 {dimension_numbers = #tpu.dot_dimension_numbers<[1], [0], [0], [1], [0, 0, 1, 1], [], []>} : vector<8x11xbf16>, vector<11x128xbf16>, vector<8x128xf32> -> vector<8x128xf32>
    %72 = arith.addf %71, %15 : vector<8x128xf32>
    %cst_46 = arith.constant 0.000000e+00 : f32
    %73 = vector.broadcast %cst_46 : f32 to vector<8x128xf32>
    %74 = arith.cmpf oge, %72, %73 : vector<8x128xf32>
    %cst_47 = arith.constant 2.000000e-01 : f32
    %75 = vector.broadcast %cst_47 : f32 to vector<8x128xf32>
    %76 = arith.mulf %75, %72 : vector<8x128xf32>
    %77 = arith.select %74, %72, %76 : vector<8x128xi1>, vector<8x128xf32>
    %78 = arith.truncf %77 : vector<8x128xf32> to vector<8x128xbf16>
    %cst_48 = arith.constant dense<0.000000e+00> : vector<16x128xf32>
    %79 = tpu.matmul %2, %78, %cst_48 {dimension_numbers = #tpu.dot_dimension_numbers<[1], [0], [0], [1], [0, 0, 1, 1], [], []>} : vector<16x8xbf16>, vector<8x128xbf16>, vector<16x128xf32> -> vector<16x128xf32>
    %80 = arith.addf %79, %7 : vector<16x128xf32>
    %cst_49 = arith.constant 0.000000e+00 : f32
    %81 = vector.broadcast %cst_49 : f32 to vector<16x128xf32>
    %82 = arith.cmpf oge, %80, %81 : vector<16x128xf32>
    %cst_50 = arith.constant 2.000000e-01 : f32
    %83 = vector.broadcast %cst_50 : f32 to vector<16x128xf32>
    %84 = arith.mulf %83, %80 : vector<16x128xf32>
    %85 = arith.select %82, %80, %84 : vector<16x128xi1>, vector<16x128xf32>
    %86 = arith.truncf %85 : vector<16x128xf32> to vector<16x128xbf16>
    %cst_51 = arith.constant dense<0.000000e+00> : vector<16x128xf32>
    %87 = tpu.matmul %3, %86, %cst_51 {dimension_numbers = #tpu.dot_dimension_numbers<[1], [0], [0], [1], [0, 0, 1, 1], [], []>} : vector<16x16xbf16>, vector<16x128xbf16>, vector<16x128xf32> -> vector<16x128xf32>
    %88 = arith.addf %87, %10 : vector<16x128xf32>
    %cst_52 = arith.constant 0.000000e+00 : f32
    %89 = vector.broadcast %cst_52 : f32 to vector<16x128xf32>
    %90 = arith.cmpf oge, %88, %89 : vector<16x128xf32>
    %cst_53 = arith.constant 2.000000e-01 : f32
    %91 = vector.broadcast %cst_53 : f32 to vector<16x128xf32>
    %92 = arith.mulf %91, %88 : vector<16x128xf32>
    %93 = arith.select %90, %88, %92 : vector<16x128xi1>, vector<16x128xf32>
    %94 = arith.addf %68, %93 : vector<16x128xf32>
    %c0_54 = arith.constant 0 : index
    %c3 = arith.constant 3 : index
    %c0_55 = arith.constant 0 : index
    %c0_56 = arith.constant 0 : index
    %95 = vector.load %arg3[%c0_54, %c3, %c0_55, %c0_56] : memref<1x4x11x128xbf16, #tpu.memory_space<vmem>>, vector<1x1x11x128xbf16>
    %96 = vector.shape_cast %95 : vector<1x1x11x128xbf16> to vector<11x128xbf16>
    %cst_57 = arith.constant dense<0.000000e+00> : vector<8x128xf32>
    %97 = tpu.matmul %0, %96, %cst_57 {dimension_numbers = #tpu.dot_dimension_numbers<[1], [0], [0], [1], [0, 0, 1, 1], [], []>} : vector<8x11xbf16>, vector<11x128xbf16>, vector<8x128xf32> -> vector<8x128xf32>
    %98 = arith.addf %97, %15 : vector<8x128xf32>
    %cst_58 = arith.constant 0.000000e+00 : f32
    %99 = vector.broadcast %cst_58 : f32 to vector<8x128xf32>
    %100 = arith.cmpf oge, %98, %99 : vector<8x128xf32>
    %cst_59 = arith.constant 2.000000e-01 : f32
    %101 = vector.broadcast %cst_59 : f32 to vector<8x128xf32>
    %102 = arith.mulf %101, %98 : vector<8x128xf32>
    %103 = arith.select %100, %98, %102 : vector<8x128xi1>, vector<8x128xf32>
    %104 = arith.truncf %103 : vector<8x128xf32> to vector<8x128xbf16>
    %cst_60 = arith.constant dense<0.000000e+00> : vector<16x128xf32>
    %105 = tpu.matmul %2, %104, %cst_60 {dimension_numbers = #tpu.dot_dimension_numbers<[1], [0], [0], [1], [0, 0, 1, 1], [], []>} : vector<16x8xbf16>, vector<8x128xbf16>, vector<16x128xf32> -> vector<16x128xf32>
    %106 = arith.addf %105, %7 : vector<16x128xf32>
    %cst_61 = arith.constant 0.000000e+00 : f32
    %107 = vector.broadcast %cst_61 : f32 to vector<16x128xf32>
    %108 = arith.cmpf oge, %106, %107 : vector<16x128xf32>
    %cst_62 = arith.constant 2.000000e-01 : f32
    %109 = vector.broadcast %cst_62 : f32 to vector<16x128xf32>
    %110 = arith.mulf %109, %106 : vector<16x128xf32>
    %111 = arith.select %108, %106, %110 : vector<16x128xi1>, vector<16x128xf32>
    %112 = arith.truncf %111 : vector<16x128xf32> to vector<16x128xbf16>
    %cst_63 = arith.constant dense<0.000000e+00> : vector<16x128xf32>
    %113 = tpu.matmul %3, %112, %cst_63 {dimension_numbers = #tpu.dot_dimension_numbers<[1], [0], [0], [1], [0, 0, 1, 1], [], []>} : vector<16x16xbf16>, vector<16x128xbf16>, vector<16x128xf32> -> vector<16x128xf32>
    %114 = arith.addf %113, %10 : vector<16x128xf32>
    %cst_64 = arith.constant 0.000000e+00 : f32
    %115 = vector.broadcast %cst_64 : f32 to vector<16x128xf32>
    %116 = arith.cmpf oge, %114, %115 : vector<16x128xf32>
    %cst_65 = arith.constant 2.000000e-01 : f32
    %117 = vector.broadcast %cst_65 : f32 to vector<16x128xf32>
    %118 = arith.mulf %117, %114 : vector<16x128xf32>
    %119 = arith.select %116, %114, %118 : vector<16x128xi1>, vector<16x128xf32>
    %120 = arith.addf %94, %119 : vector<16x128xf32>
    %cst_66 = arith.constant 2.500000e-01 : f32
    %121 = vector.broadcast %cst_66 : f32 to vector<16x128xf32>
    %122 = arith.mulf %120, %121 : vector<16x128xf32>
    %c0_67 = arith.constant 0 : index
    %c0_68 = arith.constant 0 : index
    %c0_69 = arith.constant 0 : index
    %123 = vector.load %arg11[%c0_67, %c0_68, %c0_69] : memref<1x16x128xf32, #tpu.memory_space<vmem>>, vector<1x16x128xf32>
    %124 = vector.shape_cast %123 : vector<1x16x128xf32> to vector<16x128xf32>
    %125 = vector.shape_cast %122 : vector<16x128xf32> to vector<1x16x128xf32>
    tpu.vector_store %arg11[%c0_67, %c0_68, %c0_69], %125 {strides = array<i32>} : memref<1x16x128xf32, #tpu.memory_space<vmem>>, vector<1x16x128xf32>,
    return
  }
  func.func @transform_0(%arg0: i32, %arg1: i32) -> (i32, i32, i32) {
    %c0_i32 = arith.constant 0 : i32
    %c0_i32_0 = arith.constant 0 : i32
    return %arg0, %c0_i32, %arg1 : i32, i32, i32
  }
  func.func @transform_1(%arg0: i32, %arg1: i32) -> (i32, i32, i32, i32) {
    %c0_i32 = arith.constant 0 : i32
    %c0_i32_0 = arith.constant 0 : i32
    %c0_i32_1 = arith.constant 0 : i32
    return %arg0, %c0_i32, %c0_i32_0, %arg1 : i32, i32, i32, i32
  }
  func.func @transform_2(%arg0: i32, %arg1: i32) -> (i32, i32) {
    %c0_i32 = arith.constant 0 : i32
    %c0_i32_0 = arith.constant 0 : i32
    %c0_i32_1 = arith.constant 0 : i32
    return %c0_i32, %c0_i32_0 : i32, i32
  }
  func.func @transform_3(%arg0: i32, %arg1: i32) -> (i32, i32) {
    %c0_i32 = arith.constant 0 : i32
    %c0_i32_0 = arith.constant 0 : i32
    %c0_i32_1 = arith.constant 0 : i32
    return %c0_i32, %c0_i32_0 : i32, i32
  }
  func.func @transform_4(%arg0: i32, %arg1: i32) -> (i32, i32) {
    %c0_i32 = arith.constant 0 : i32
    %c0_i32_0 = arith.constant 0 : i32
    %c0_i32_1 = arith.constant 0 : i32
    return %c0_i32, %c0_i32_0 : i32, i32
  }
  func.func @transform_5(%arg0: i32, %arg1: i32) -> (i32, i32) {
    %c0_i32 = arith.constant 0 : i32
    %c0_i32_0 = arith.constant 0 : i32
    %c0_i32_1 = arith.constant 0 : i32
    return %c0_i32, %c0_i32_0 : i32, i32
  }
  func.func @transform_6(%arg0: i32, %arg1: i32) -> (i32, i32) {
    %c0_i32 = arith.constant 0 : i32
    %c0_i32_0 = arith.constant 0 : i32
    %c0_i32_1 = arith.constant 0 : i32
    return %c0_i32, %c0_i32_0 : i32, i32
  }
  func.func @transform_7(%arg0: i32, %arg1: i32) -> (i32, i32) {
    %c0_i32 = arith.constant 0 : i32
    %c0_i32_0 = arith.constant 0 : i32
    %c0_i32_1 = arith.constant 0 : i32
    return %c0_i32, %c0_i32_0 : i32, i32
  }
  func.func @transform_8(%arg0: i32, %arg1: i32) -> (i32, i32) {
    %c0_i32 = arith.constant 0 : i32
    %c0_i32_0 = arith.constant 0 : i32
    %c0_i32_1 = arith.constant 0 : i32
    return %c0_i32, %c0_i32_0 : i32, i32
  }
  func.func @transform_9(%arg0: i32, %arg1: i32) -> (i32, i32, i32) {
    %c0_i32 = arith.constant 0 : i32
    %c0_i32_0 = arith.constant 0 : i32
    return %arg0, %c0_i32, %arg1 : i32, i32, i32
  }
}

</mosaic_0001>

<bundles_post_ra>
// kernel: neg.5
= control target key start
LH: loop header
LB: loop body
LE: loop exit
PB: predicated region body
PF: predicated region fallthrough
CT: control target
= control target key end

     0   :  { %s24_s0 = inlined_call_operand.vmem [shape: f32[2,16], index: 0, kind: input, shape index: {}]   ;;  %s25_s1 = inlined_call_operand.vmem [shape: f32[2,16], index: 1, kind: output, shape index: {}]  }
   0x1   :  { %v2_v0 = vld [vmem:[%s24_s0] sm:$0x3] }
   0x2   :  { %v5_v1 = vxor.u32 2147483648, %v2_v0 }
   0x4   :  { %7 = vst [vmem:[%s25_s1] sm:$0x3] %v5_v1 }

// kernel: lpfa_forward.1
= control target key start
LH: loop header
LB: loop body
LE: loop exit
PB: predicated region body
PF: predicated region fallthrough
CT: control target
= control target key end

     0   :  { %s1855_s0 = inlined_call_operand.vmem [shape: bf16[2,11,128], index: 0, kind: input, shape index: {}]   ;;  %s1856_s1 = inlined_call_operand.vmem [shape: bf16[2,4,11,128], index: 1, kind: input, shape index: {}]   ;;  %s1857_s2 = inlined_call_operand.vmem [shape: bf16[8,11], index: 2, kind: input, shape index: {}]   ;;  %s1858_s3 = inlined_call_operand.vmem [shape: bf16[8,11], index: 3, kind: input, shape index: {}]   ;;  %s1859_s4 = inlined_call_operand.vmem [shape: f32[8,1], index: 4, kind: input, shape index: {}]   ;;  %s1860_s5 = inlined_call_operand.vmem [shape: bf16[16,8], index: 5, kind: input, shape index: {}]   ;;  %s1861_s6 = inlined_call_operand.vmem [shape: f32[16,1], index: 6, kind: input, shape index: {}]   ;;  %s1862_s7 = inlined_call_operand.vmem [shape: bf16[16,16], index: 7, kind: input, shape index: {}]   ;;  %s1863_s8 = inlined_call_operand.vmem [shape: f32[16,1], index: 8, kind: input, shape index: {}]   ;;  %s1864_s9 = inlined_call_operand.hbm [shape: f32[2,16,128], index: 9, kind: output, shape index: {}]  }
   0x1   :  { %1865 = sst [smem:[#allocation5_spill]] %s1859_s4 }
   0x2   :  { %14 = vsyncpa [#allocation3], 0 }
   0x3   :  { %16 = vsyncpa [#allocation3 + $0x1], 0  ;;  %s1593_s30 = smov 0   ;;  %s1595_s10 = smov 0  }
   0x4   :  { %s1597_s11 = smov 0   ;;  %s1599_s12 = smov 0  }
   0x5   :  { %s1601_s13 = smov 0   ;;  %s1603_s14 = smov 0  }
   0x6 LB: > { %s1238_s15 = sadd.s32 4294967295, %s1534_s14   ;;  %s1239_s16 = sadd.s32 4294967294, %s1534_s14   ;;  %s1534_s14 = sphi %s1603_s14, %s22_s14   ;;  %s1530_s13 = sphi %s1601_s13, %s1873_s13   ;;  %s1526_s12 = sphi %s1599_s12, %s1872_s12   ;;  %s1522_s11 = sphi %s1597_s11, %s1871_s11   ;;  %s1518_s10 = sphi %s1595_s10, %s1870_s10   ;;  %s1514_s30 = sphi %s1593_s30, %s1869_s30  }
   0x7   : > { %s34_s17 = sadd.s32 1, %s1530_s13  ;;  %s246_s18 = sadd.s32 1, %s1522_s11 }
   0x8   : > { %p36_p0 = scmp.ge.s32.totalorder %s34_s17, 2  ;;  %p256_p1 = scmp.ne.s32.totalorder %s1522_s11, %s1518_s10 }
   0x9   : > { %p257_p2 = scmp.eq.s32.totalorder %s1238_s15, 1  ;;  %p262_p3 = scmp.ne.s32.totalorder %s1518_s10, %s1514_s30 }
   0xa   : > { %s1875_s17 = smov (%p36_p0, %s34_s17), 0  ;;  %p263_p5 = scmp.eq.s32.totalorder %s1239_s16, 1 }
   0xb   : > { %p1633_p4 = por %p257_p2, %p256_p1  ;;  %s241_s20 = ssub.s32 %s1530_s13, %s1875_s17 }
   0xc   : > { %p1242_p6 = scmp.ge.s32.totalorder %s1534_s14, 1  ;;  %p244_p7 = scmp.eq.s32.totalorder %s241_s20, 0 }
   0xd   : > { %p1640_p8 = por %p263_p5, %p262_p3  ;;  %p324_p9 = scmp.lt.s32.totalorder %s1534_s14, 3 }
   0xe   : > { %s1646_s22 = scalar_select %p244_p7, %s1522_s11, %s246_s18  }
   0xf   : > { %p325_p10 = pnand %p1242_p6, %p324_p9 }
  0x10   : > { %p371_p11 = scmp.lt.s32.totalorder (!%p325_p10), %s1526_s12, 1  ;;  %vm435_vm0 = vcmask (!%p325_p10), 1044480   ;;  %v1536_v0 = vmov (!%p325_p10), 0.0   ;;  %s1868_s4 = sld [smem:[#allocation5_spill]] (!%p325_p10)  ;;  %vm436_vm1 = vcmask (!%p325_p10), 1045504   ;;  %v1537_v2 = vmov (!%p325_p10), 65535  }
  0x11   : > { %328 = sbr.rel (%p325_p10) target bundleno = 1417 (0x589), region = 56  ;;  %1308 = vmatprep.subr.bf16.mxu0 (!%p325_p10), %v1536_v0  ;;  %1314 = vmatprep.subr.bf16.mxu1 (!%p325_p10), %v1536_v0  ;;  %v437_v3 = vsel (!%p325_p10), %vm435_vm0, 4294967295, %v1537_v2  ;;  %vm1538_vm2 = vmmov (!%p325_p10), 0   ;;  %v1539_v4 = vmov (!%p325_p10), 0   ;;  %v395_v6 = vld [vmem:[%s1861_s6] sm:$0xff] (!%p325_p10)  ;;  %v408_v9 = vld [vmem:[%s1863_s8 + $0x8] sm:$0xff] (!%p325_p10) }
  0x12   : > { %1310 = vmatprep.mubr.msk.bf16.mxu0 (!%p325_p10), %vm1538_vm2, %v1536_v0  ;;  %1316 = vmatprep.mubr.msk.bf16.mxu1 (!%p325_p10), %vm1538_vm2, %v1536_v0  ;;  %v1667_v5 = vsel (!%p325_p10), %vm436_vm1, %v437_v3, 0  ;;  %v389_v12 = vld [vmem:[%s1858_s3] sm:$0xf] (!%p325_p10)  ;;  %vm431_vm3 = vcmask (!%p325_p10), 89088   ;;  %v396_v14 = vld [vmem:[%s1861_s6 + $0x8] sm:$0xff] (!%p325_p10)  ;;  %vm548_vm5 = vcmask (!%p325_p10), 1043456  }
  0x13   : > { %1447 = vset.pattern.permute.xlu0 (!%p325_p10), %v1539_v4  ;;  %1448 = vset.pattern.permute.xlu1 (!%p325_p10), %v1539_v4  ;;  %v1684_v13 = vld [vmem:[%s1857_s2] sm:$0xf] (!%p325_p10)  ;;  %vm544_vm6 = vcmask (!%p325_p10), 64512   ;;  %vm605_vm9 = vcmask (!%p325_p10), 130048   ;;  %s1281_s28 = sshll.u32 (!%p325_p10), %s1526_s12, 8  ;;  %s1540_s24 = smov (!%p325_p10), [#allocation2]  }
  0x14   : > { %404 = vperm.xlu1 (!%p325_p10), %1448, %v396_v14   ;;  %v407_v15 = vld [vmem:[%s1863_s8] sm:$0xff] (!%p325_p10)  ;;  %s1805_s18 = scalar_lea.hbm (!%p325_p10), %s1864_s9, %s1281_s28 }
  0x15   : > { %v1709_v32 = vld [vmem:[%s1860_s5] sm:$0xff] (!%p325_p10)  }
  0x16   : > { %v394_v1 = vld [vmem:[%s1868_s4] sm:$0xff] (!%p325_p10) }
  0x17   : > { %423 = vperm.xlu0 (!%p325_p10), %1447, %v394_v1   ;;  %v1732_v50 = vld [vmem:[%s1862_s7] sm:$0xff] (!%p325_p10)  }
  0x18   : > { %s372_s25 = scalar_select %p371_p11, %s1526_s12, 1  ;;  %411 = vperm.xlu1 %1448, %v407_v15  }
  0x1a   : > { %s1279_s26 = sshll.u32 %s372_s25, 3  ;;  %s1280_s27 = sshll.u32 %s372_s25, 5 }
  0x1b   : > { %s378_s15 = scalar_lea.vmem %s1855_s0, %s1279_s26  ;;  %s1665_s20 = scalar_lea.vmem %s1856_s1, %s1280_s27  ;;  %399 = vperm.xlu0 %1447, %v395_v6  }
  0x1c   : > { %v1449_v7 = vld [vmem:[%s378_s15] sm:$0x3f]   ;;  %v1452_v29 = vld [vmem:[%s1665_s20 + $0x8] sm:$0x3f]   ;;  %v1454_v56 = vld [vmem:[%s1665_s20 + $0x10] sm:$0x3f]  }
  0x1d   : > { %v1450_v8 = vld [vmem:[%s1665_s20] sm:$0x3f]   ;;  %v440_v10 = vand.u32 %v1449_v7, %v1667_v5  ;;  %v667_v33 = vand.u32 %v1452_v29, %v1667_v5  ;;  %v822_v58 = vand.u32 %v1454_v56, %v1667_v5  ;;  %s1460_s25 = sshll.u32 %s1540_s24, 4  ;;  %s1461_s25 = int_to_ptr.vmem [resolvable:$false] %s1460_s25 }
  0x1e   : > { %v493_v11 = vand.u32 %v1450_v8, %v1667_v5  ;;  %s1462_s26 = scalar_lea.vmem %s1461_s25, 512 }
  0x1f   : > { %1309 = vmatpush3.bf16.msra.mxu0 %v440_v10  ;;  %416 = vperm.xlu0 %1447, %v408_v9  }
  0x20   : > { %1315 = vmatpush3.bf16.msra.mxu1 %v493_v11  ;;  %1320 = vmatprep.subr.bf16.mxu0 %v1536_v0 }
  0x21   : > { %1326 = vmatprep.subr.bf16.mxu1 %v1536_v0 }
  0x22   : > { %1311 = vmatmul.mubr.msk.bf16.vlgmr.msra.gmra.mrb[0].mxu0 %vm431_vm3, %v389_v12 }
  0x23   : > { %1317 = vmatmul.mubr.msk.bf16.vlgmr.msra.gmra.mrb[0].mxu1 %vm431_vm3, %v1684_v13  ;;  %1322 = vmatprep.mubr.msk.bf16.mxu0 %vm1538_vm2, %v1536_v0 }
  0x24   : > { %1328 = vmatprep.mubr.msk.bf16.mxu1 %vm1538_vm2, %v1536_v0 }
  0x93   : > { %v1725_v38 = vpop.permute.xlu1 %404 }
  0x96   : > { %v424_v16 = vpop.permute.xlu0 %423 }
  0x9a   : > { %v1722_v34 = vpop.permute.xlu0 %399 }
  0xf5   : > { %v476_v17 = vpop.f32.mrb[0].mxu0 }
  0xf6   : > { %v1701_v18 = vadd.f32 %v476_v17, %v424_v16  ;;  %v529_v19 = vpop.f32.mrb[0].mxu1  ;;  %v1312_v20 = vpop.f32.mrb[1].mxu0 }
  0xf7   : > { %v1318_v21 = vpop.f32.mrb[1].mxu1  ;;  %v479_v22 = vpop.f32.mrb[2].mxu0 }
  0xf8   : > { %v530_v23 = vadd.f32 %v529_v19, %v1701_v18  ;;  %v532_v24 = vpop.f32.mrb[2].mxu1  ;;  %v1313_v25 = vpop.f32.mrb[3].mxu0  ;;  %v1455_v22 = vld [vmem:[%s1665_s20 + $0x18] sm:$0x3f]   ;;  %s368_s20 = sand.u32 1, %s1518_s10  }
  0xf9   : > { %v1319_v26 = vpop.f32.mrb[3].mxu1  ;;  %v977_v24 = vand.u32 %v1455_v22, %v1667_v5  ;;  %v1773_v25 = vpop.permute.xlu1 %411  ;;  %s1243_s27 = sshll.u32 %s368_s20, 4  ;;  %s1809_s23 = scalar_lea.sflag [#allocation3], %s368_s20 }
  0xfa   : > { %vm535_vm4 = vcmp.ge.f32.partialorder %v530_v23, 0.0  ;;  %v536_v27 = vmul.f32 0.2, %v530_v23  ;;  %v1776_v5 = vpop.permute.xlu0 %416  ;;  %s370_s29 = scalar_lea.vmem [#allocation2], %s1243_s27 }
  0xfb   : > { %s1142_s4 = sshll.u32 %s370_s29, 4  ;;  %s1807_s4 = int_to_ptr.vmem [resolvable:$true] %s1142_s4 }
  0xfc   : > { %v537_v28 = vsel %vm535_vm4, %v530_v23, %v536_v27  ;;  %s1456_s12 = scalar_lea.vmem %s1807_s4, 256  ;;  %p1463_p1 = scmp.lt.s32.totalorder %s1807_s4, %s1461_s25 }
  0xfd   : > { %v538_v30 = vpack.c.bf16 %v537_v28, %v537_v28  ;;  %p1457_p12 = scmp.ne.s32.totalorder %s1807_s4, %s1456_s12  ;;  %p1464_p2 = scmp.lt.s32.totalorder %s1462_s26, %s1456_s12 }
  0xff   : > { %v550_v31 = vsel %vm548_vm5, %v538_v30, 0  ;;  %p1458_p13 = pnand %p1457_p12, %p1633_p4  ;;  %p1465_p3 = por %p1464_p2, %p1463_p1 }
 0x100   : > { %1321 = vmatpush3.bf16.msra.mxu0 %v550_v31 }
 0x101   : > { %1332 = vmatprep.subr.bf16.mxu0 %v1536_v0  ;;  %p1459_p0 = pneg %p1458_p13 }
 0x103   : > { %1323 = vmatmul.mubr.msk.bf16.vlgmr.msra.gmra.mrb[4].mxu0 %vm544_vm6, %v1709_v32  ;;  %p1466_p5 = pnand %p1465_p3, %p1459_p0 }
 0x104   : > { %1333 = vmatpush3.bf16.msra.mxu0 %v667_v33  ;;  %1334 = vmatprep.mubr.msk.bf16.mxu0 %vm1538_vm2, %v1536_v0 }
 0x105   : > { %1344 = vmatprep.subr.bf16.mxu0 %v1536_v0 }
 0x10b   : > { %1335 = vmatmul.mubr.msk.bf16.vlgmr.msra.gmra.mrb[8].mxu0 %vm431_vm3, %v1684_v13 }
 0x10c   : > { %1346 = vmatprep.mubr.msk.bf16.mxu0 %vm1538_vm2, %v1536_v0 }
 0x1d6   : > { %v586_v35 = vpop.f32.mrb[4].mxu0 }
 0x1d7   : > { %v587_v36 = vadd.f32 %v586_v35, %v1722_v34  ;;  %v1324_v37 = vpop.f32.mrb[5].mxu0 }
 0x1d8   : > { %v589_v39 = vpop.f32.mrb[6].mxu0 }
 0x1d9   : > { %v595_v40 = vmul.f32 0.2, %v587_v36  ;;  %v590_v41 = vadd.f32 %v589_v39, %v1725_v38  ;;  %v1325_v42 = vpop.f32.mrb[7].mxu0  ;;  %vm593_vm7 = vcmp.ge.f32.partialorder %v587_v36, 0.0 }
 0x1db   : > { %vm594_vm8 = vcmp.ge.f32.partialorder %v590_v41, 0.0  ;;  %v596_v43 = vmul.f32 0.2, %v590_v41  ;;  %v597_v44 = vsel %vm593_vm7, %v587_v36, %v595_v40 }
 0x1dd   : > { %v598_v45 = vsel %vm594_vm8, %v590_v41, %v596_v43 }
 0x1de   : > { %v599_v46 = vpack.c.bf16 %v598_v45, %v597_v44  ;;  %v703_v47 = vpop.f32.mrb[8].mxu0 }
 0x1df   : > { %v704_v48 = vadd.f32 %v703_v47, %v1701_v18  ;;  %v1336_v49 = vpop.f32.mrb[9].mxu0 }
 0x1e0   : > { %1327 = vmatpush3.bf16.msra.mxu1 %v599_v46  ;;  %v706_v51 = vpop.f32.mrb[10].mxu0 }
 0x1e1   : > { %vm709_vm10 = vcmp.ge.f32.partialorder %v704_v48, 0.0  ;;  %v710_v52 = vmul.f32 0.2, %v704_v48  ;;  %v1337_v53 = vpop.f32.mrb[11].mxu0  ;;  %1338 = vmatprep.subr.bf16.mxu1 %v1536_v0 }
 0x1e3   : > { %v711_v54 = vsel %vm709_vm10, %v704_v48, %v710_v52  ;;  %1329 = vmatmul.mubr.msk.bf16.vlgmr.msra.gmra.mrb[4].mxu1 %vm605_vm9, %v1732_v50 }
 0x1e4   : > { %v712_v55 = vpack.c.bf16 %v711_v54, %v711_v54  ;;  %1340 = vmatprep.mubr.msk.bf16.mxu1 %vm1538_vm2, %v1536_v0 }
 0x1e6   : > { %v714_v57 = vsel %vm548_vm5, %v712_v55, 0 }
 0x1e7   : > { %1339 = vmatpush3.bf16.msra.mxu1 %v714_v57 }
 0x1e8   : > { %1350 = vmatprep.subr.bf16.mxu1 %v1536_v0 }
 0x1eb   : > { %1341 = vmatmul.mubr.msk.bf16.vlgmr.msra.gmra.mrb[8].mxu1 %vm544_vm6, %v1709_v32 }
 0x1ec   : > { %1351 = vmatpush3.bf16.msra.mxu1 %v822_v58  ;;  %1352 = vmatprep.mubr.msk.bf16.mxu1 %vm1538_vm2, %v1536_v0 }
 0x1ed   : > { %1362 = vmatprep.subr.bf16.mxu1 %v1536_v0 }
 0x1f3   : > { %1353 = vmatmul.mubr.msk.bf16.vlgmr.msra.gmra.mrb[12].mxu1 %vm431_vm3, %v1684_v13 }
 0x1f4   : > { %1364 = vmatprep.mubr.msk.bf16.mxu1 %vm1538_vm2, %v1536_v0 }
 0x2b6   : > { %v643_v59 = vpop.f32.mrb[4].mxu1 }
 0x2b7   : > { %v1330_v60 = vpop.f32.mrb[5].mxu1  ;;  %v644_v26 = vadd.f32 %v643_v59, %v1773_v25 }
 0x2b8   : > { %v646_v61 = vpop.f32.mrb[6].mxu1 }
 0x2b9   : > { %v1331_v62 = vpop.f32.mrb[7].mxu1  ;;  %v647_v27 = vadd.f32 %v646_v61, %v1776_v5  ;;  %v652_v29 = vmul.f32 0.2, %v644_v26  ;;  %vm650_vm14 = vcmp.ge.f32.partialorder %v644_v26, 0.0 }
 0x2bb   : > { %v653_v35 = vmul.f32 0.2, %v647_v27  ;;  %vm651_vm0 = vcmp.ge.f32.partialorder %v647_v27, 0.0  ;;  %v654_v39 = vsel %vm650_vm14, %v644_v26, %v652_v29 }
 0x2bd   : > { %v655_v43 = vsel %vm651_vm0, %v647_v27, %v653_v35 }
 0x2be   : > { %v750_v63 = vpop.f32.mrb[8].mxu1 }
 0x2bf   : > { %v751_v1 = vadd.f32 %v750_v63, %v1722_v34  ;;  %v1342_v2 = vpop.f32.mrb[9].mxu1 }
 0x2c0   : > { %v753_v3 = vpop.f32.mrb[10].mxu1 }
 0x2c1   : > { %v759_v4 = vmul.f32 0.2, %v751_v1  ;;  %v754_v6 = vadd.f32 %v753_v3, %v1725_v38  ;;  %v1343_v7 = vpop.f32.mrb[11].mxu1  ;;  %vm757_vm11 = vcmp.ge.f32.partialorder %v751_v1, 0.0 }
 0x2c3   : > { %vm758_vm12 = vcmp.ge.f32.partialorder %v754_v6, 0.0  ;;  %v760_v8 = vmul.f32 0.2, %v754_v6  ;;  %v761_v9 = vsel %vm757_vm11, %v751_v1, %v759_v4 }
 0x2c5   : > { %v762_v10 = vsel %vm758_vm12, %v754_v6, %v760_v8 }
 0x2c6   : > { %v763_v11 = vpack.c.bf16 %v762_v10, %v761_v9  ;;  %v858_v12 = vpop.f32.mrb[12].mxu1 }
 0x2c7   : > { %v859_v14 = vadd.f32 %v858_v12, %v1701_v18  ;;  %v1354_v15 = vpop.f32.mrb[13].mxu1 }
 0x2c8   : > { %1345 = vmatpush3.bf16.msra.mxu0 %v763_v11  ;;  %v861_v16 = vpop.f32.mrb[14].mxu1 }
 0x2c9   : > { %vm864_vm13 = vcmp.ge.f32.partialorder %v859_v14, 0.0  ;;  %v865_v17 = vmul.f32 0.2, %v859_v14  ;;  %v1355_v19 = vpop.f32.mrb[15].mxu1  ;;  %1356 = vmatprep.subr.bf16.mxu0 %v1536_v0 }
 0x2cb   : > { %v866_v20 = vsel %vm864_vm13, %v859_v14, %v865_v17  ;;  %1347 = vmatmul.mubr.msk.bf16.vlgmr.msra.gmra.mrb[12].mxu0 %vm605_vm9, %v1732_v50 }
 0x2cc   : > { %v867_v21 = vpack.c.bf16 %v866_v20, %v866_v20  ;;  %1358 = vmatprep.mubr.msk.bf16.mxu0 %vm1538_vm2, %v1536_v0 }
 0x2ce   : > { %v869_v23 = vsel %vm548_vm5, %v867_v21, 0 }
 0x2cf   : > { %1357 = vmatpush3.bf16.msra.mxu0 %v869_v23 }
 0x2d0   : > { %1368 = vmatprep.subr.bf16.mxu0 %v1536_v0 }
 0x2d3   : > { %1359 = vmatmul.mubr.msk.bf16.vlgmr.msra.gmra.mrb[16].mxu0 %vm544_vm6, %v1709_v32 }
 0x2d4   : > { %1369 = vmatpush3.bf16.msra.mxu0 %v977_v24  ;;  %1370 = vmatprep.mubr.msk.bf16.mxu0 %vm1538_vm2, %v1536_v0 }
 0x2d5   : > { %1380 = vmatprep.subr.bf16.mxu0 %v1536_v0 }
 0x2db   : > { %1371 = vmatmul.mubr.msk.bf16.vlgmr.msra.gmra.mrb[20].mxu0 %vm431_vm3, %v1684_v13 }
 0x2dc   : > { %1382 = vmatprep.mubr.msk.bf16.mxu0 %vm1538_vm2, %v1536_v0 }
 0x39e   : > { %v798_v28 = vpop.f32.mrb[12].mxu0 }
 0x39f   : > { %v799_v30 = vadd.f32 %v798_v28, %v1773_v25  ;;  %v1348_v31 = vpop.f32.mrb[13].mxu0 }
 0x3a0   : > { %v801_v33 = vpop.f32.mrb[14].mxu0 }
 0x3a1   : > { %vm805_vm15 = vcmp.ge.f32.partialorder %v799_v30, 0.0  ;;  %v807_v13 = vmul.f32 0.2, %v799_v30  ;;  %v802_v36 = vadd.f32 %v801_v33, %v1776_v5  ;;  %v1349_v37 = vpop.f32.mrb[15].mxu0 }
 0x3a3   : > { %v809_v40 = vsel %vm805_vm15, %v799_v30, %v807_v13  ;;  %vm806_vm1 = vcmp.ge.f32.partialorder %v802_v36, 0.0  ;;  %v808_v41 = vmul.f32 0.2, %v802_v36 }
 0x3a4   : > { %v811_v42 = vadd.f32 %v809_v40, %v654_v39 }
 0x3a5   : > { %v810_v44 = vsel %vm806_vm1, %v802_v36, %v808_v41 }
 0x3a6   : > { %v812_v45 = vadd.f32 %v810_v44, %v655_v43  ;;  %v905_v46 = vpop.f32.mrb[16].mxu0 }
 0x3a7   : > { %v906_v47 = vadd.f32 %v905_v46, %v1722_v34  ;;  %v1360_v48 = vpop.f32.mrb[17].mxu0 }
 0x3a8   : > { %v908_v49 = vpop.f32.mrb[18].mxu0 }
 0x3a9   : > { %v914_v51 = vmul.f32 0.2, %v906_v47  ;;  %v909_v52 = vadd.f32 %v908_v49, %v1725_v38  ;;  %v1361_v53 = vpop.f32.mrb[19].mxu0  ;;  %vm912_vm3 = vcmp.ge.f32.partialorder %v906_v47, 0.0 }
 0x3ab   : > { %vm913_vm4 = vcmp.ge.f32.partialorder %v909_v52, 0.0  ;;  %v915_v54 = vmul.f32 0.2, %v909_v52  ;;  %v916_v55 = vsel %vm912_vm3, %v906_v47, %v914_v51 }
 0x3ad   : > { %v917_v56 = vsel %vm913_vm4, %v909_v52, %v915_v54 }
 0x3ae   : > { %v918_v57 = vpack.c.bf16 %v917_v56, %v916_v55  ;;  %v1013_v58 = vpop.f32.mrb[20].mxu0 }
 0x3af   : > { %v1014_v59 = vadd.f32 %v1013_v58, %v1701_v18  ;;  %v1372_v60 = vpop.f32.mrb[21].mxu0 }
 0x3b0   : > { %1363 = vmatpush3.bf16.msra.mxu1 %v918_v57  ;;  %v1016_v61 = vpop.f32.mrb[22].mxu0 }
 0x3b1   : > { %vm1019_vm7 = vcmp.ge.f32.partialorder %v1014_v59, 0.0  ;;  %v1020_v62 = vmul.f32 0.2, %v1014_v59  ;;  %v1373_v63 = vpop.f32.mrb[23].mxu0  ;;  %1374 = vmatprep.subr.bf16.mxu1 %v1536_v0 }
 0x3b3   : > { %v1021_v1 = vsel %vm1019_vm7, %v1014_v59, %v1020_v62  ;;  %1365 = vmatmul.mubr.msk.bf16.vlgmr.msra.gmra.mrb[16].mxu1 %vm605_vm9, %v1732_v50 }
 0x3b4   : > { %v1022_v2 = vpack.c.bf16 %v1021_v1, %v1021_v1  ;;  %1376 = vmatprep.mubr.msk.bf16.mxu1 %vm1538_vm2, %v1536_v0 }
 0x3b6   : > { %v1024_v3 = vsel %vm548_vm5, %v1022_v2, 0 }
 0x3b7   : > { %1375 = vmatpush3.bf16.msra.mxu1 %v1024_v3 }
 0x3bb   : > { %1377 = vmatmul.mubr.msk.bf16.vlgmr.msra.gmra.mrb[20].mxu1 %vm544_vm6, %v1709_v32 }
 0x486   : > { %v953_v18 = vpop.f32.mrb[16].mxu1 }
 0x487   : > { %v954_v4 = vadd.f32 %v953_v18, %v1773_v25  ;;  %v1366_v6 = vpop.f32.mrb[17].mxu1 }
 0x488   : > { %v956_v7 = vpop.f32.mrb[18].mxu1 }
 0x489   : > { %vm960_vm8 = vcmp.ge.f32.partialorder %v954_v4, 0.0  ;;  %v962_v8 = vmul.f32 0.2, %v954_v4  ;;  %v957_v9 = vadd.f32 %v956_v7, %v1776_v5  ;;  %v1367_v10 = vpop.f32.mrb[19].mxu1 }
 0x48b   : > { %v964_v11 = vsel %vm960_vm8, %v954_v4, %v962_v8  ;;  %vm961_vm10 = vcmp.ge.f32.partialorder %v957_v9, 0.0  ;;  %v963_v12 = vmul.f32 0.2, %v957_v9 }
 0x48c   : > { %v966_v0 = vadd.f32 %v964_v11, %v811_v42 }
 0x48d   : > { %v965_v14 = vsel %vm961_vm10, %v957_v9, %v963_v12 }
 0x48e   : > { %v967_v15 = vadd.f32 %v965_v14, %v812_v45  ;;  %v1060_v16 = vpop.f32.mrb[20].mxu1 }
 0x48f   : > { %v1061_v32 = vadd.f32 %v1060_v16, %v1722_v34  ;;  %v1378_v17 = vpop.f32.mrb[21].mxu1 }
 0x490   : > { %v1063_v19 = vpop.f32.mrb[22].mxu1 }
 0x491   : > { %v1069_v20 = vmul.f32 0.2, %v1061_v32  ;;  %v1064_v21 = vadd.f32 %v1063_v19, %v1725_v38  ;;  %v1379_v22 = vpop.f32.mrb[23].mxu1  ;;  %vm1067_vm2 = vcmp.ge.f32.partialorder %v1061_v32, 0.0 }
 0x493   : > { %vm1068_vm5 = vcmp.ge.f32.partialorder %v1064_v21, 0.0  ;;  %v1070_v23 = vmul.f32 0.2, %v1064_v21  ;;  %v1071_v24 = vsel %vm1067_vm2, %v1061_v32, %v1069_v20 }
 0x495   : > { %v1072_v26 = vsel %vm1068_vm5, %v1064_v21, %v1070_v23 }
 0x496   : > { %v1073_v27 = vpack.c.bf16 %v1072_v26, %v1071_v24 }
 0x498   : > { %1381 = vmatpush3.bf16.msra.mxu0 %v1073_v27 }
 0x49b   : > { %1383 = vmatmul.mubr.msk.bf16.vlgmr.msra.gmra.mrb[24].mxu0 %vm605_vm9, %v1732_v50 }
 0x56e   : > { %v1108_v34 = vpop.f32.mrb[24].mxu0 }
 0x56f   : > { %v1109_v28 = vadd.f32 %v1108_v34, %v1773_v25  ;;  %v1384_v29 = vpop.f32.mrb[25].mxu0 }
 0x570   : > { %v1111_v30 = vpop.f32.mrb[26].mxu0 }
 0x571   : > { %vm1115_vm6 = vcmp.ge.f32.partialorder %v1109_v28, 0.0  ;;  %v1117_v38 = vmul.f32 0.2, %v1109_v28  ;;  %v1112_v31 = vadd.f32 %v1111_v30, %v1776_v5  ;;  %v1385_v33 = vpop.f32.mrb[27].mxu0 }
 0x573   : > { %v1119_v35 = vsel %vm1115_vm6, %v1109_v28, %v1117_v38  ;;  %vm1116_vm11 = vcmp.ge.f32.partialorder %v1112_v31, 0.0  ;;  %v1118_v13 = vmul.f32 0.2, %v1112_v31 }
 0x574   : > { %v1121_v36 = vadd.f32 %v1119_v35, %v966_v0 }
 0x575   : > { %v1120_v50 = vsel %vm1116_vm11, %v1112_v31, %v1118_v13 }
 0x576   : > { %v1123_v37 = vmul.f32 0.25, %v1121_v36  ;;  %v1122_v39 = vadd.f32 %v1120_v50, %v967_v15 }
 0x578   : > { %1125 = vst [vmem:[%s370_s29] sm:$0xff] %v1123_v37  ;;  %v1124_v25 = vmul.f32 0.25, %v1122_v39 }
 0x57a   : > { %1126 = vst [vmem:[%s370_s29 + $0x8] sm:$0xff] %v1124_v25 }
 0x57b   : > { %1469 = shalt.err (!%p1466_p5)
}
 0x57c   : > { %s1470_s20 = scalar_lea.hbm %s1805_s18, 256  ;;  %s1474_s29 = scalar_lea.hbm %s1864_s9, 512 }
 0x57d   : > { %p1471_p6 = scmp.ne.s32.totalorder %s1805_s18, %s1470_s20  ;;  %p1475_p10 = scmp.lt.u32.totalorder %s1805_s18, %s1864_s9 }
 0x57e   : > { %p1476_p11 = scmp.lt.u32.totalorder %s1474_s29, %s1470_s20  ;;  %p1478_p13 = scmp.lt.u32.totalorder %s1470_s20, %s1805_s18 }
 0x57f   : > { %p1472_p7 = pnand %p1471_p6, %p1633_p4 }
 0x580   : > { %p1477_p12 = por %p1476_p11, %p1475_p10 }
 0x581   : > { %p1473_p9 = pneg %p1472_p7 }
 0x582   : > { %p1479_p0 = por %p1478_p13, %p1477_p12 }
 0x584   : > { %p1480_p1 = pnand %p1479_p0, %p1473_p9 }
 0x586   : > { %1483 = shalt.err (!%p1480_p1)
}
 0x587   : > { %s1541_s12 = smov 128   ;;  %s1542_s24 = smov 8  }
 0x588   : > { %1386 = dma.vmem_to_hbm [thread:$0]  (%p1633_p4), %s1807_s4, 256, %s1805_s18, %s1809_s23, %s1541_s12, %s1541_s12, %s1542_s24  }
 0x589 PF: > { %p1392_p2 = scmp.ge.s32.totalorder %s1534_s14, 2  ;;  %s1157_s25 = sand.u32 1, %s1514_s30  }
 0x58a   : > { %s1158_s26 = scalar_lea.sflag [#allocation3], %s1157_s25 }
 0x58b   : > { %p1389_p3 = pnand %p1392_p2, %p1640_p8 }
 0x58d   : > { %1509 = dma.done.wait (!%p1389_p3), %s1158_s26, 256  }
 0x58e   : > { %1511 = vsyncadd (!%p1389_p3), %s1158_s26, 4294967040  ;;  %s22_s14 = sadd.s32 1, %s1534_s14   ;;  %s1869_s30 = smov %s1518_s10 }
 0x58f   : > { %p19_p5 = scmp.ge.s32.totalorder %s22_s14, 4   ;;  %s1870_s10 = smov %s1522_s11 }
 0x590   : > { %s1871_s11 = smov %s1646_s22  ;;  %s1872_s12 = smov %s1530_s13 }
 0x591   : > { %s1873_s13 = smov %s1875_s17  ;;  %21 = sbr.rel (!%p19_p5) target bundleno = 6 (0x6), region = 97 }
 0x598   :  { %1163 = vsyncpa [#allocation3], 1 }
 0x599   :  { %1165 = vsyncpa [#allocation3 + $0x1], 1 }

</bundles_post_ra>
